<compile_context>
chip_gen: v7x
topology: tpu7x:2x2x1
jax: 0.10.0
libtpu: 0.0.40
codegen_flags: <defaults>
</compile_context>

<pallas_src>
import functools
import math

import jax
import jax.numpy as jnp
from jax.experimental import pallas as pl
from jax.experimental.pallas import tpu as pltpu


VMEM_LIMIT = 48 * 1024 * 1024      # explicit scoped-VMEM limit (< v7x 64 MiB physical)


# ----------------------------------------------------------------------------- helpers
def _rep(shape):
    """BlockSpec for a replicated (whole-array) operand."""
    n = len(shape)
    return pl.BlockSpec(shape, lambda *_: (0,) * n)


def _choose_tm(m):
    # Capped at 256 so token tiles + resident weights fit v7x's 64 MiB VMEM
    # (v5e / v6e with 128 MiB could go to 512-1024).
    if m % 256 == 0:
        return 256
    if m % 128 == 0:
        return 128
    return 256 if m >= 256 else 128


def _pad_rows(x2d, tm):
    m = x2d.shape[0]
    mp = ((m + tm - 1) // tm) * tm
    if mp != m:
        x2d = jnp.pad(x2d, ((0, mp - m), (0, 0)))
    return x2d, m


def _layer_norm(x, gamma, beta, eps=1e-5):
    mu = jnp.mean(x, axis=-1, keepdims=True)
    var = jnp.mean(jnp.square(x - mu), axis=-1, keepdims=True)
    return (x - mu) * jax.lax.rsqrt(var + eps) * gamma + beta


# ----------------------------------------------------------------------------- kernels
def _linear_kernel(x_ref, w_ref, b_ref, o_ref):
    y = jnp.dot(x_ref[...].astype(jnp.bfloat16), w_ref[...],
                preferred_element_type=jnp.float32) + b_ref[...]
    o_ref[...] = y.astype(o_ref.dtype)


def _ff1_qkv_kernel(x_ref, lng, lnb, w1, b1, w2, b2, mlng, mlnb, wqkv, bqkv,
                    y_ref, qkv_ref):
    # ConformerPositionwiseFeedForwardV1 (0.5*ff + residual), then the MHSA module's
    # LayerNorm and a fused QKV projection emitted as ONE lane-dense (tm, 3D) bf16 slab.
    x = x_ref[...].astype(jnp.float32)
    xn = _layer_norm(x, lng[...], lnb[...])
    h = jnp.dot(xn.astype(jnp.bfloat16), w1[...], preferred_element_type=jnp.float32) + b1[...]
    h = h * jax.nn.sigmoid(h)                                   # SiLU
    y = 0.5 * (jnp.dot(h.astype(jnp.bfloat16), w2[...],
                       preferred_element_type=jnp.float32) + b2[...]) + x
    yn = _layer_norm(y, mlng[...], mlnb[...])
    qkv = jnp.dot(yn.astype(jnp.bfloat16), wqkv[...],
                  preferred_element_type=jnp.float32) + bqkv[...]
    y_ref[...] = y.astype(y_ref.dtype)
    qkv_ref[...] = qkv.astype(qkv_ref.dtype)


def _ff2_kernel(x_ref, lng, lnb, w1, b1, w2, b2, flng, flnb, o_ref):
    # ConformerPositionwiseFeedForwardV1 (0.5*ff + residual) + fused block-final LayerNorm.
    x = x_ref[...].astype(jnp.float32)
    xn = _layer_norm(x, lng[...], lnb[...])
    h = jnp.dot(xn.astype(jnp.bfloat16), w1[...], preferred_element_type=jnp.float32) + b1[...]
    h = h * jax.nn.sigmoid(h)
    y = jnp.dot(h.astype(jnp.bfloat16), w2[...], preferred_element_type=jnp.float32) + b2[...]
    o_ref[...] = _layer_norm(0.5 * y + x, flng[...], flnb[...]).astype(o_ref.dtype)


def _attn_conv_kernel(*args, nwin, num_heads, carry, chunk_size, kernel_size):
    # Fused: chunked MHSA over the carry-over window (ConformerMHSAV1 semantics) with
    # in-kernel attention mask, per-head out-projection accumulation, residual, masked_fill
    # and the full ConformerConvolutionV1 module, all on one (C', D) chunk per grid step.
    qkv_refs = args[0:nwin]
    y_ref = args[nwin]
    mrow_refs = args[nwin + 1: 2 * nwin + 1]
    mcol_ref = args[2 * nwin + 1]
    (wo_ref, bo_ref, cln_g, cln_b, pw1_w, pw1_b, dw_w, dw_b,
     bn_s, bn_b, pw2_w, pw2_b, o_ref) = args[2 * nwin + 2:]

    qi = pl.program_id(1)
    _, ce, d = y_ref.shape
    dh = d // num_heads
    scale = 1.0 / math.sqrt(dh)

    # ---- per-window K/V + additive mask bias (computed once, shared across heads) -----
    kpos = jax.lax.broadcasted_iota(jnp.int32, (1, ce), 1)
    q = None
    kv_list, bias_list = [], []
    for j in range(nwin):
        kv = qkv_refs[j][0]                                     # (ce, 3D) bf16
        if j == nwin - 1:
            q = kv[:, :d]                                       # own chunk's queries
        kv_list.append((kv[:, d:2 * d], kv[:, 2 * d:]))
        kvalid = mrow_refs[j][0] > 0.5                          # (1, ce) key padding
        if j == nwin - 1:
            allowed = kvalid                                    # own chunk: all C+R keys
        else:
            # carried chunks: no lookahead frames; out-of-range carry slots fully masked
            allowed = jnp.logical_and(kvalid, kpos < chunk_size)
            allowed = jnp.logical_and(allowed, (qi - (carry - j)) >= 0)
        bias_list.append(jnp.where(allowed, jnp.float32(0.0), jnp.float32(-1e30)))

    # ---- multi-head attention, per-head (no (C',H,dh) relayout, no concat) -------------
    out = bo_ref[...] + y_ref[0].astype(jnp.float32)            # out-proj bias + residual
    for h in range(num_heads):
        qh = q[:, h * dh:(h + 1) * dh]
        s_list = []
        for j in range(nwin):
            kh, _ = kv_list[j]
            s = jax.lax.dot_general(qh, kh[:, h * dh:(h + 1) * dh],
                                    (((1,), (1,)), ((), ())),
                                    preferred_element_type=jnp.float32)
            s_list.append(s * scale + bias_list[j])             # (ce, ce)
        m = s_list[0].max(axis=-1, keepdims=True)
        for j in range(1, nwin):
            m = jnp.maximum(m, s_list[j].max(axis=-1, keepdims=True))
        l = jnp.zeros((ce, 1), jnp.float32)
        acc = jnp.zeros((ce, dh), jnp.float32)
        for j in range(nwin):
            _, vh = kv_list[j]
            p = jnp.exp(s_list[j] - m)
            l = l + jnp.sum(p, axis=-1, keepdims=True)
            acc = acc + jnp.dot(p.astype(jnp.bfloat16), vh[:, h * dh:(h + 1) * dh],
                                preferred_element_type=jnp.float32)
        ctx = acc * pl.reciprocal(jnp.maximum(l, 1e-30), approx=True)
        out = out + jnp.dot(ctx.astype(jnp.bfloat16), wo_ref[h * dh:(h + 1) * dh, :],
                            preferred_element_type=jnp.float32)

    # ---- masked_fill + ConformerConvolutionV1 (fused, no extra HBM round trip) ---------
    xm = out * mcol_ref[0]                                      # masked_fill, (ce, D)
    xn = _layer_norm(xm, cln_g[...], cln_b[...])
    h1 = jnp.dot(xn.astype(jnp.bfloat16), pw1_w[...],
                 preferred_element_type=jnp.float32) + pw1_b[...]
    g = h1[:, :d] * jax.nn.sigmoid(h1[:, d:])                   # GLU over channel dim
    pad_l = (kernel_size - 1) // 2
    pad_r = kernel_size - 1 - pad_l
    parts = []
    if pad_l:
        parts.append(jnp.zeros((pad_l, d), jnp.float32))
    parts.append(g)
    if pad_r:
        parts.append(jnp.zeros((pad_r, d), jnp.float32))
    gp = jnp.concatenate(parts, axis=0) if len(parts) > 1 else g
    # TODO(synk): depthwise conv is zero-padded at each chunk boundary (per-chunk conv);
    #             no conv context is carried across chunks.
    acc = jnp.zeros((ce, d), jnp.float32)
    for kk in range(kernel_size):                               # one padded scratch, K slices
        acc = acc + gp[kk:kk + ce, :] * dw_w[kk:kk + 1, :]
    acc = acc + dw_b[...]
    # TODO(synk): BatchNorm1d realized in eval mode as a folded per-channel affine
    #             (running stats); training-mode batch statistics are not computed.
    yb = acc * bn_s[...] + bn_b[...]
    yb = yb * jax.nn.sigmoid(yb)                                # SiLU
    y2 = jnp.dot(yb.astype(jnp.bfloat16), pw2_w[...],
                 preferred_element_type=jnp.float32) + pw2_b[...]
    o_ref[0] = (y2 + xm).astype(o_ref.dtype)                    # conv residual = masked x


# ----------------------------------------------------------------------------- wrappers
def linear_module(x2d, w, b):
    tm = _choose_tm(x2d.shape[0])
    x2d_p, m0 = _pad_rows(x2d, tm)
    mp, fin = x2d_p.shape
    dout = w.shape[1]
    out = pl.pallas_call(
        _linear_kernel,
        out_shape=jax.ShapeDtypeStruct((mp, dout), jnp.bfloat16),
        grid=(mp // tm,),
        in_specs=[pl.BlockSpec((tm, fin), lambda i: (i, 0)),
                  _rep((fin, dout)), _rep((1, dout))],
        out_specs=pl.BlockSpec((tm, dout), lambda i: (i, 0)),
        compiler_params=pltpu.CompilerParams(
            dimension_semantics=("parallel",), vmem_limit_bytes=VMEM_LIMIT),
    )(x2d_p, w, b)
    return out[:m0]


def ff1_qkv_module(x2d, p_ff, p_mhsa):
    tm = _choose_tm(x2d.shape[0])
    x2d_p, m0 = _pad_rows(x2d, tm)
    mp, d = x2d_p.shape
    hdim = p_ff["w1"].shape[1]
    y, qkv = pl.pallas_call(
        _ff1_qkv_kernel,
        out_shape=(jax.ShapeDtypeStruct((mp, d), jnp.bfloat16),
                   jax.ShapeDtypeStruct((mp, 3 * d), jnp.bfloat16)),
        grid=(mp // tm,),
        in_specs=[pl.BlockSpec((tm, d), lambda i: (i, 0)),
                  _rep((1, d)), _rep((1, d)),
                  _rep((d, hdim)), _rep((1, hdim)),
                  _rep((hdim, d)), _rep((1, d)),
                  _rep((1, d)), _rep((1, d)),
                  _rep((d, 3 * d)), _rep((1, 3 * d))],
        out_specs=(pl.BlockSpec((tm, d), lambda i: (i, 0)),
                   pl.BlockSpec((tm, 3 * d), lambda i: (i, 0))),
        compiler_params=pltpu.CompilerParams(
            dimension_semantics=("parallel",), vmem_limit_bytes=VMEM_LIMIT),
    )(x2d_p, p_ff["ln_g"], p_ff["ln_b"], p_ff["w1"], p_ff["b1"], p_ff["w2"], p_ff["b2"],
      p_mhsa["ln_g"], p_mhsa["ln_b"], p_mhsa["wqkv"], p_mhsa["bqkv"])
    return y[:m0], qkv[:m0]


def ff2_module(x2d, p, flng, flnb):
    tm = _choose_tm(x2d.shape[0])
    x2d_p, m0 = _pad_rows(x2d, tm)
    mp, d = x2d_p.shape
    hdim = p["w1"].shape[1]
    out = pl.pallas_call(
        _ff2_kernel,
        out_shape=jax.ShapeDtypeStruct((mp, d), jnp.bfloat16),
        grid=(mp // tm,),
        in_specs=[pl.BlockSpec((tm, d), lambda i: (i, 0)),
                  _rep((1, d)), _rep((1, d)),
                  _rep((d, hdim)), _rep((1, hdim)),
                  _rep((hdim, d)), _rep((1, d)),
                  _rep((1, d)), _rep((1, d))],
        out_specs=pl.BlockSpec((tm, d), lambda i: (i, 0)),
        compiler_params=pltpu.CompilerParams(
            dimension_semantics=("parallel",), vmem_limit_bytes=VMEM_LIMIT),
    )(x2d_p, p["ln_g"], p["ln_b"], p["w1"], p["b1"], p["w2"], p["b2"], flng, flnb)
    return out[:m0]


def attn_conv_module(qkv3, y3, mrow, mcol, p_mhsa, p_conv, num_heads, carry,
                     chunk_size, n_chunks, kernel_size):
    # qkv3: (B*N, C', 3D) bf16; y3: (B*N, C', D) bf16;
    # mrow: (B*N, 1, C') f32 (key mask); mcol: (B*N, C', 1) f32 (conv masked_fill).
    bn, ce, d3 = qkv3.shape
    d = d3 // 3
    b = bn // n_chunks
    nwin = carry + 1

    def win_idx(j):
        def f(bi, qi):
            return (bi * n_chunks + jnp.maximum(qi - (carry - j), 0), 0, 0)
        return f

    def self_idx(bi, qi):
        return (bi * n_chunks + qi, 0, 0)

    in_specs, inputs = [], []
    for j in range(nwin):                                           # K/V window chunks
        in_specs.append(pl.BlockSpec((1, ce, d3), win_idx(j)))
        inputs.append(qkv3)
    in_specs.append(pl.BlockSpec((1, ce, d), self_idx)); inputs.append(y3)
    for j in range(nwin):                                           # window key masks
        in_specs.append(pl.BlockSpec((1, 1, ce), win_idx(j)))
        inputs.append(mrow)
    in_specs.append(pl.BlockSpec((1, ce, 1), self_idx)); inputs.append(mcol)
    weights = [p_mhsa["wo"], p_mhsa["bo"],
               p_conv["ln_g"], p_conv["ln_b"], p_conv["pw1_w"], p_conv["pw1_b"],
               p_conv["dw_w"], p_conv["dw_b"], p_conv["bn_s"], p_conv["bn_b"],
               p_conv["pw2_w"], p_conv["pw2_b"]]
    for wgt in weights:
        in_specs.append(_rep(wgt.shape)); inputs.append(wgt)

    kern = functools.partial(_attn_conv_kernel, nwin=nwin, num_heads=num_heads,
                             carry=carry, chunk_size=chunk_size, kernel_size=kernel_size)
    return pl.pallas_call(
        kern,
        out_shape=jax.ShapeDtypeStruct((bn, ce, d), jnp.bfloat16),
        grid=(b, n_chunks),
        in_specs=in_specs,
        out_specs=pl.BlockSpec((1, ce, d), self_idx),
        compiler_params=pltpu.CompilerParams(
            dimension_semantics=("parallel", "parallel"), vmem_limit_bytes=VMEM_LIMIT),
    )(*inputs)


# ----------------------------------------------------------------------------- glue (plain JAX)
def add_lookahead_v2(x, mask, lookahead_size):
    # x: [B, N, C, D], mask: [B, N, C] -> append first R frames of next chunk to each chunk.
    if lookahead_size <= 0:
        return x, mask
    fut = jnp.concatenate(
        [x[:, 1:, :lookahead_size], jnp.zeros_like(x[:, :1, :lookahead_size])], axis=1)
    futm = jnp.concatenate(
        [mask[:, 1:, :lookahead_size], jnp.zeros_like(mask[:, :1, :lookahead_size])], axis=1)
    return jnp.concatenate([x, fut], axis=2), jnp.concatenate([mask, futm], axis=2)


def conformer_block(x, mrow, mcol, p, num_heads, chunk_size, carry, conv_kernel):
    # x: [B, N, C', D] bf16 residual stream.
    b, n, ce, d = x.shape
    y2d, qkv2d = ff1_qkv_module(x.reshape(b * n * ce, d), p["ff1"], p["mhsa"])
    y3 = y2d.reshape(b * n, ce, d)
    qkv3 = qkv2d.reshape(b * n, ce, 3 * d)
    x3 = attn_conv_module(qkv3, y3, mrow, mcol, p["mhsa"], p["conv"],
                          num_heads, carry, chunk_size, n, conv_kernel)
    xf = ff2_module(x3.reshape(b * n * ce, d), p["ff2"],
                    p["final_ln"]["g"], p["final_ln"]["b"])
    return xf.reshape(b, n, ce, d)


def conformer_encoder_forward(data, seq_mask, params, num_heads, conv_kernel,
                              lookahead_size=0, carry_over_size=1):
    # data: [B, N, C, F], seq_mask: [B, N, C] bool  (chunked path of forward()).
    b, n, c, f_in = data.shape
    # TODO(synk): real frontend (cfg.frontend(), e.g. VGG conv subsampling) config not provided;
    #             using a per-frame linear projection F -> F' with mask passthrough.
    xf = linear_module(data.reshape(b * n * c, f_in),
                       params["frontend_w"], params["frontend_b"])
    d = xf.shape[-1]
    num_frames = b * n * c
    x = xf.reshape(b, n, c, d)

    x, sm = add_lookahead_v2(x, seq_mask, lookahead_size)

    # pad extended chunk length C+R to a multiple of 8 so attention/conv blocks are
    # (8,128)-aligned; padded rows carry mask=False and are stripped at the end.
    ce = x.shape[2]
    ce_pad = ((ce + 7) // 8) * 8
    if ce_pad != ce:
        x = jnp.pad(x, ((0, 0), (0, 0), (0, ce_pad - ce), (0, 0)))
        sm = jnp.pad(sm, ((0, 0), (0, 0), (0, ce_pad - ce)))

    mrow = sm.astype(jnp.float32).reshape(b * n, 1, ce_pad)
    mcol = sm.astype(jnp.float32).reshape(b * n, ce_pad, 1)

    for blk in params["blocks"]:
        x = conformer_block(x, mrow, mcol, blk, num_heads, c, carry_over_size, conv_kernel)

    x = x[:, :, :c]                      # strip lookahead + alignment padding
    sm_out = sm[:, :, :c]
    assert x.shape[0] * x.shape[1] * x.shape[2] == num_frames
    return x.astype(jnp.float32), sm_out


# ----------------------------------------------------------------------------- params
def init_params(key, f_in, d, ff, kconv, num_layers):
    keys = iter(jax.random.split(key, 4 + 16 * num_layers))

    def w(shape, scale=0.02):
        # matmul weights stored in bf16 (halves weight DMA, feeds the MXU natively)
        return (jax.random.normal(next(keys), shape, jnp.float32) * scale).astype(jnp.bfloat16)

    def wf32(shape, scale=0.02):
        return jax.random.normal(next(keys), shape, jnp.float32) * scale

    zeros = lambda s: jnp.zeros(s, jnp.float32)
    ones = lambda s: jnp.ones(s, jnp.float32)

    def ff_p():
        return {"ln_g": ones((1, d)), "ln_b": zeros((1, d)),
                "w1": w((d, ff)), "b1": zeros((1, ff)),
                "w2": w((ff, d)), "b2": zeros((1, d))}

    params = {"frontend_w": w((f_in, d)), "frontend_b": zeros((1, d)), "blocks": []}
    for _ in range(num_layers):
        blk = {
            "ff1": ff_p(),
            "mhsa": {"ln_g": ones((1, d)), "ln_b": zeros((1, d)),
                     "wqkv": w((d, 3 * d)), "bqkv": zeros((1, 3 * d)),
                     "wo": w((d, d)), "bo": zeros((1, d))},
            "conv": {"ln_g": ones((1, d)), "ln_b": zeros((1, d)),
                     "pw1_w": w((d, 2 * d)), "pw1_b": zeros((1, 2 * d)),
                     "dw_w": wf32((kconv, d)), "dw_b": zeros((1, d)),
                     # BatchNorm1d (eval) folded: scale = g/sqrt(var+eps), shift = b - mean*scale
                     "bn_s": ones((1, d)), "bn_b": zeros((1, d)),
                     "pw2_w": w((d, d)), "pw2_b": zeros((1, d))},
            "ff2": ff_p(),
            "final_ln": {"g": ones((1, d)), "b": zeros((1, d))},
        }
        params["blocks"].append(blk)
    return params


# ----------------------------------------------------------------------------- main
if __name__ == "__main__":
    B, N, C, F_IN = 2, 4, 8, 16           # batch, chunks, chunk size, input features
    D, FF, HEADS, KCONV = 128, 256, 4, 7  # model dim (lane-dense), ff dim, heads, conv kernel
    LAYERS, LOOKAHEAD, CARRY = 2, 2, 2

    key = jax.random.PRNGKey(0)
    k_data, k_par = jax.random.split(key)
    data = jax.random.normal(k_data, (B, N, C, F_IN), jnp.float32)

    lengths = jnp.array([N * C, N * C - 4], jnp.int32)           # second sequence padded
    t_idx = jnp.arange(N * C).reshape(N, C)
    seq_mask = t_idx[None, :, :] < lengths[:, None, None]        # [B, N, C] bool

    params = init_params(k_par, F_IN, D, FF, KCONV, LAYERS)

    out, out_mask = conformer_encoder_forward(
        data, seq_mask, params, num_heads=HEADS, conv_kernel=KCONV,
        lookahead_size=LOOKAHEAD, carry_over_size=CARRY)

    jax.block_until_ready(out)
    jax.block_until_ready(out_mask)
    assert out.shape == (B, N, C, D) and out_mask.shape == (B, N, C)
    print("KERNEL_OK")
</pallas_src>

<mosaic_0001>
module attributes {stable_mosaic.version = 11 : i64} {
  func.func @_linear_kernel(%arg0: i32, %arg1: memref<128x16xf32, #tpu.memory_space<vmem>>, %arg2: memref<16x128xbf16, #tpu.memory_space<vmem>>, %arg3: memref<1x128xf32, #tpu.memory_space<vmem>>, %arg4: memref<128x128xbf16, #tpu.memory_space<vmem>>) attributes {dimension_semantics = [#tpu.dimension_semantics<parallel>], iteration_bounds = array<i64: 1>, scalar_prefetch = 0 : i64, scratch_operands = 0 : i64, tpu.core_type = #tpu.core_type<tc>, window_params = [{transform_indices = @transform_0, window_bounds = array<i64: 128, 16>}, {pipeline_mode = #tpu.pipeline_mode<synchronous>, transform_indices = @transform_1, window_bounds = array<i64: 16, 128>}, {pipeline_mode = #tpu.pipeline_mode<synchronous>, transform_indices = @transform_2, window_bounds = array<i64: 1, 128>}, {transform_indices = @transform_3, window_bounds = array<i64: 128, 128>}]} {
    %c0 = arith.constant 0 : index
    %c0_0 = arith.constant 0 : index
    %0 = vector.load %arg1[%c0, %c0_0] : memref<128x16xf32, #tpu.memory_space<vmem>>, vector<128x16xf32>
    %1 = arith.truncf %0 : vector<128x16xf32> to vector<128x16xbf16>
    %c0_1 = arith.constant 0 : index
    %c0_2 = arith.constant 0 : index
    %2 = vector.load %arg2[%c0_1, %c0_2] : memref<16x128xbf16, #tpu.memory_space<vmem>>, vector<16x128xbf16>
    %cst = arith.constant dense<0.000000e+00> : vector<128x128xf32>
    %3 = tpu.matmul %1, %2, %cst {dimension_numbers = #tpu.dot_dimension_numbers<[1], [0], [0], [1], [0, 0, 1, 1], [], []>} : vector<128x16xbf16>, vector<16x128xbf16>, vector<128x128xf32> -> vector<128x128xf32>
    %c0_3 = arith.constant 0 : index
    %c0_4 = arith.constant 0 : index
    %4 = vector.load %arg3[%c0_3, %c0_4] : memref<1x128xf32, #tpu.memory_space<vmem>>, vector<1x128xf32>
    %5 = vector.broadcast %4 : vector<1x128xf32> to vector<128x128xf32>
    %6 = arith.addf %3, %5 : vector<128x128xf32>
    %7 = arith.truncf %6 : vector<128x128xf32> to vector<128x128xbf16>
    %c0_5 = arith.constant 0 : index
    %c0_6 = arith.constant 0 : index
    %8 = vector.load %arg4[%c0_5, %c0_6] : memref<128x128xbf16, #tpu.memory_space<vmem>>, vector<128x128xbf16>
    tpu.vector_store %arg4[%c0_5, %c0_6], %7 {strides = array<i32>} : memref<128x128xbf16, #tpu.memory_space<vmem>>, vector<128x128xbf16>,
    return
  }
  func.func @transform_0(%arg0: i32) -> (i32, i32) {
    %c0_i32 = arith.constant 0 : i32
    %c0_i32_0 = arith.constant 0 : i32
    return %arg0, %c0_i32 : i32, i32
  }
  func.func @transform_1(%arg0: i32) -> (i32, i32) {
    %c0_i32 = arith.constant 0 : i32
    %c0_i32_0 = arith.constant 0 : i32
    %c0_i32_1 = arith.constant 0 : i32
    return %c0_i32, %c0_i32_0 : i32, i32
  }
  func.func @transform_2(%arg0: i32) -> (i32, i32) {
    %c0_i32 = arith.constant 0 : i32
    %c0_i32_0 = arith.constant 0 : i32
    %c0_i32_1 = arith.constant 0 : i32
    return %c0_i32, %c0_i32_0 : i32, i32
  }
  func.func @transform_3(%arg0: i32) -> (i32, i32) {
    %c0_i32 = arith.constant 0 : i32
    %c0_i32_0 = arith.constant 0 : i32
    return %arg0, %c0_i32 : i32, i32
  }
}

</mosaic_0001>

<bundles_post_ra>
// kernel: tpu_custom_call.1
= control target key start
LH: loop header
LB: loop body
LE: loop exit
PB: predicated region body
PF: predicated region fallthrough
CT: control target
= control target key end

     0   :  { %vm55_vm0 = vcmask 130048   ;;  %s516_s0 = inlined_call_operand.vmem [shape: f32[128,16], index: 0, kind: input, shape index: {}]   ;;  %s517_s1 = inlined_call_operand.vmem [shape: bf16[16,128], index: 1, kind: input, shape index: {}]   ;;  %s518_s2 = inlined_call_operand.vmem [shape: f32[1,128], index: 2, kind: input, shape index: {}]   ;;  %s519_s3 = inlined_call_operand.hbm [shape: bf16[128,128], index: 3, kind: output, shape index: {}]  }
   0x1   :  { %v394_v0 = vld [vmem:[%s517_s1] sm:$0xff]   ;;  %v17_v2 = vld [vmem:[%s516_s0 + $0x8] sm:$0xff]  ;;  %v18_v6 = vld [vmem:[%s516_s0 + $0x10] sm:$0xff] }
   0x2   :  { %v16_v1 = vld [vmem:[%s516_s0] sm:$0xff]  ;;  %371 = vmatprep.subr.bf16.mxu0 %v394_v0  ;;  %389 = vmatprep.subr.bf16.mxu1 %v394_v0  ;;  %v25_v5 = vld [vmem:[%s516_s0 + $0x48] sm:$0xff]  ;;  %v19_v7 = vld [vmem:[%s516_s0 + $0x18] sm:$0xff] }
   0x3   :  { %v24_v3 = vld [vmem:[%s516_s0 + $0x40] sm:$0xff]  ;;  %v32_v4 = vpack.c.bf16 %v17_v2, %v16_v1  ;;  %372 = vmatpush3.bf16.msra.mxu0 %v394_v0  ;;  %390 = vmatpush3.bf16.msra.mxu1 %v394_v0  ;;  %v33_v9 = vpack.c.bf16 %v19_v7, %v18_v6  ;;  %v26_v10 = vld [vmem:[%s516_s0 + $0x50] sm:$0xff]  ;;  %v27_v11 = vld [vmem:[%s516_s0 + $0x58] sm:$0xff] }
   0x4   :  { %v36_v8 = vpack.c.bf16 %v25_v5, %v24_v3  ;;  %v20_v12 = vld [vmem:[%s516_s0 + $0x20] sm:$0xff]  ;;  %v37_v13 = vpack.c.bf16 %v27_v11, %v26_v10  ;;  %v21_v14 = vld [vmem:[%s516_s0 + $0x28] sm:$0xff]  ;;  %v22_v19 = vld [vmem:[%s516_s0 + $0x30] sm:$0xff] }
   0x5   :  { %373 = vmatprep.mubr.msk.bf16.mxu0 %vm55_vm0, %v32_v4  ;;  %v28_v15 = vld [vmem:[%s516_s0 + $0x60] sm:$0xff]  ;;  %v29_v16 = vld [vmem:[%s516_s0 + $0x68] sm:$0xff]  ;;  %v34_v17 = vpack.c.bf16 %v21_v14, %v20_v12 }
   0x6   :  { %381 = vmatprep.mubr.msk.bf16.mxu1 %vm55_vm0, %v36_v8  ;;  %v38_v18 = vpack.c.bf16 %v29_v16, %v28_v15  ;;  %374 = vmatmul.mubr.msk.bf16.vlgmr.msra.gmra.mrb[0].mxu0 %vm55_vm0, %v33_v9 }
   0x7   :  { %382 = vmatmul.mubr.msk.bf16.vlgmr.msra.gmra.mrb[0].mxu1 %vm55_vm0, %v37_v13 }
   0x8   :  { %8 = vsyncpa [#allocation3], 0  ;;  %377 = vmatprep.mubr.msk.bf16.mxu0 %vm55_vm0, %v34_v17  ;;  %385 = vmatprep.mubr.msk.bf16.mxu1 %vm55_vm0, %v38_v18  ;;  %v23_v20 = vld [vmem:[%s516_s0 + $0x38] sm:$0xff]  ;;  %v30_v21 = vld [vmem:[%s516_s0 + $0x70] sm:$0xff] }
   0x9   :  { %v31_v22 = vld [vmem:[%s516_s0 + $0x78] sm:$0xff]  ;;  %v35_v23 = vpack.c.bf16 %v23_v20, %v22_v19  ;;  %v273_v26 = vld [vmem:[%s518_s2] ss:$0 sm:$0xff]  ;;  %s419_s0 = smov [#allocation2]  }
   0xa   :  { %v39_v24 = vpack.c.bf16 %v31_v22, %v30_v21  ;;  %s262_s2 = sshll.u32 %s419_s0, 4  ;;  %s263_s2 = int_to_ptr.vmem [resolvable:$true] %s262_s2 }
   0xb   :  { %s395_s20 = scalar_lea.vmem %s263_s2, 1024  ;;  %p400_p1 = scmp.lt.s32.totalorder %s263_s2, %s263_s2 }
   0xc   :  { %p396_p0 = scmp.ne.s32.totalorder %s263_s2, %s395_s20  ;;  %p401_p2 = scmp.lt.s32.totalorder %s395_s20, %s395_s20 }
   0xe   :  { %378 = vmatmul.mubr.msk.bf16.gmra.mrb[4].mxu0 %vm55_vm0, %v35_v23  ;;  %p402_p3 = por %p401_p2, %p400_p1 }
   0xf   :  { %386 = vmatmul.mubr.msk.bf16.gmra.mrb[4].mxu1 %vm55_vm0, %v39_v24 }
  0x10   :  { %p403_p4 = pnand %p402_p3, %p396_p0 }
  0xd9   :  { %v375_v25 = vpop.f32.mrb[0].mxu0 }
  0xda   :  { %v383_v27 = vpop.f32.mrb[0].mxu1  ;;  %v114_v28 = vpop.f32.mrb[1].mxu0  ;;  %v123_v32 = vadd.f32 %v375_v25, %v273_v26 }
  0xdb   :  { %v146_v29 = vpop.f32.mrb[1].mxu1  ;;  %v376_v30 = vpop.f32.mrb[2].mxu0  ;;  %v155_v33 = vadd.f32 %v383_v27, %v273_v26  ;;  %v115_v38 = vadd.f32 %v273_v26, %v114_v28 }
  0xdc   :  { %v384_v31 = vpop.f32.mrb[2].mxu1  ;;  %v126_v34 = vadd.f32 %v376_v30, %v273_v26  ;;  %v117_v36 = vpop.f32.mrb[3].mxu0  ;;  %v147_v39 = vadd.f32 %v273_v26, %v146_v29 }
  0xdd   :  { %v158_v35 = vadd.f32 %v384_v31, %v273_v26  ;;  %v149_v37 = vpop.f32.mrb[3].mxu1  ;;  %v118_v40 = vadd.f32 %v273_v26, %v117_v36 }
  0xde   :  { %v150_v41 = vadd.f32 %v273_v26, %v149_v37  ;;  %v323_v42 = vpack.c.bf16 %v126_v34, %v123_v32 }
  0xdf   :  { %v343_v43 = vpack.c.bf16 %v158_v35, %v155_v33  ;;  %v318_v44 = vpack.c.bf16 %v118_v40, %v115_v38 }
  0xe0   :  { %v338_v45 = vpack.c.bf16 %v150_v41, %v147_v39  ;;  %355 = vst [vmem:[#allocation2 + $0x8] sm:$0xff] %v323_v42  }
  0xe1   :  { %359 = vst [vmem:[#allocation2 + $0x28] sm:$0xff] %v343_v43   ;;  %319 = vst [vmem:[#allocation2] sm:$0xff] %v318_v44   ;;  %v379_v46 = vpop.f32.mrb[4].mxu0 }
  0xe2   :  { %358 = vst [vmem:[#allocation2 + $0x20] sm:$0xff] %v338_v45   ;;  %v387_v47 = vpop.f32.mrb[4].mxu1  ;;  %v130_v48 = vpop.f32.mrb[5].mxu0  ;;  %v139_v52 = vadd.f32 %v379_v46, %v273_v26 }
  0xe3   :  { %v162_v49 = vpop.f32.mrb[5].mxu1  ;;  %v380_v50 = vpop.f32.mrb[6].mxu0  ;;  %v171_v53 = vadd.f32 %v387_v47, %v273_v26  ;;  %v131_v58 = vadd.f32 %v273_v26, %v130_v48 }
  0xe4   :  { %v388_v51 = vpop.f32.mrb[6].mxu1  ;;  %v142_v54 = vadd.f32 %v380_v50, %v273_v26  ;;  %v133_v56 = vpop.f32.mrb[7].mxu0  ;;  %v163_v59 = vadd.f32 %v273_v26, %v162_v49 }
  0xe5   :  { %v174_v55 = vadd.f32 %v388_v51, %v273_v26  ;;  %v165_v57 = vpop.f32.mrb[7].mxu1  ;;  %v134_v60 = vadd.f32 %v273_v26, %v133_v56 }
  0xe6   :  { %v166_v61 = vadd.f32 %v273_v26, %v165_v57  ;;  %v333_v62 = vpack.c.bf16 %v142_v54, %v139_v52 }
  0xe7   :  { %v353_v63 = vpack.c.bf16 %v174_v55, %v171_v53  ;;  %v328_v0 = vpack.c.bf16 %v134_v60, %v131_v58 }
  0xe8   :  { %v348_v1 = vpack.c.bf16 %v166_v61, %v163_v59  ;;  %357 = vst [vmem:[#allocation2 + $0x18] sm:$0xff] %v333_v62  }
  0xe9   :  { %361 = vst [vmem:[#allocation2 + $0x38] sm:$0xff] %v353_v63   ;;  %356 = vst [vmem:[#allocation2 + $0x10] sm:$0xff] %v328_v0  }
  0xea   :  { %360 = vst [vmem:[#allocation2 + $0x30] sm:$0xff] %v348_v1  }
  0xeb   :  { %406 = shalt.err (!%p403_p4)
}
  0xec   :  { %s407_s22 = scalar_lea.hbm %s519_s3, 1024 }
  0xed   :  { %p408_p5 = scmp.ne.s32.totalorder %s519_s3, %s407_s22  ;;  %p411_p6 = scmp.lt.u32.totalorder %s407_s22, %s519_s3 }
  0xef   :  { %p413_p7 = pnand %p411_p6, %p408_p5 }
  0xf1   :  { %416 = shalt.err (!%p413_p7)
}
  0xf2   :  { %s420_s27 = smov 64   ;;  %s421_s28 = smov 4  }
  0xf3   :  { %268 = dma.vmem_to_hbm [thread:$0]  %s263_s2, 1024, %s519_s3, [#allocation3], %s420_s27, %s420_s27, %s421_s28  }
  0xf4   :  { %417 = dma.done.wait [#allocation3], 1024  }
  0xf5   :  { %418 = vsyncadd [#allocation3], 4294966272 }
  0xf6   :  { %272 = vsyncpa [#allocation3], 1 }

</bundles_post_ra>
